<compile_context>
chip_gen: v6e
topology: v6e:2x2x1
jax: 0.10.0
libtpu: 0.0.40
codegen_flags: <defaults>
</compile_context>

<pallas_src>
import math
import functools

import jax
import jax.numpy as jnp
from jax import lax
from jax.experimental import pallas as pl
from jax.experimental.pallas import tpu as pltpu

NEG_INF = -1e20  # neginf(float32) in the reference module


def _round_up(x, m):
    return ((x + m - 1) // m) * m


def _seq_tiling(L):
    """Return (Lp, tq): padded sequence length and query tile size."""
    if L <= 512:
        return L, L                      # blocks equal full array dims -> legal
    Lp = _round_up(L, 128)
    tq = 512
    # Keep the live (TQ, Lp) f32 scores + probs under ~16 MiB.
    while tq > 128 and (Lp % tq != 0 or tq * Lp * 8 > (16 << 20)):
        tq //= 2
    return Lp, tq


def _slab_size(Lp):
    """Row-slab for the chunked QKV projection."""
    if Lp <= 512:
        return Lp
    for t in (512, 256, 128):
        if Lp % t == 0:
            return t
    return 128


def _vmem_cap_bytes():
    try:
        cap = pltpu.get_tpu_info().vmem_capacity_bytes
        return (cap * 3) // 4            # 96 MiB on v5e/v6e, 48 MiB on v7x
    except Exception:
        return 48 << 20                  # conservative: safe on v7x's 64 MiB


def _vmem_estimate(B, Lp, Din, Hp, Dp, tq, slab, has_mask,
                   x_itemsize, out_itemsize, buffer_weights):
    est = Lp * 3 * Hp * 2                        # resident bf16 QKV scratch
    est += 2 * Lp * Din * x_itemsize             # x block (double-buffered)
    if has_mask:
        est += 2 * tq * Lp * 2                   # additive-bias block (bf16)
    est += 2 * tq * Dp * out_itemsize            # output block
    nbuf = 1 if buffer_weights else 2
    est += nbuf * (Din * 3 * Hp * 2 + Hp * Dp * 2 + 3 * Hp * 4 + Dp * 4)
    est += 2 * tq * Lp * 4                       # scores + probs (f32) live
    est += slab * 3 * Hp * 4                     # QKV projection slab (f32)
    est += tq * (Hp + Dp) * 4                    # ctx / out live
    return int(est * 1.4) + (2 << 20)            # compiler temp / spill headroom


def _pals_kernel(*refs, hp, tq, slab, lp, valid_len, has_mask):
    """Grid = (batch, query_tile). QKV projected once per batch (qi == 0)."""
    if has_mask:
        (x_ref, m_ref, wqkv_ref, bqkv_ref, wo_ref, bo_ref,
         o_ref, qkv_ref) = refs
    else:
        (x_ref, wqkv_ref, bqkv_ref, wo_ref, bo_ref,
         o_ref, qkv_ref) = refs
        m_ref = None

    qi = pl.program_id(1)

    # Fused QKV projection for the whole sequence, once per batch element,
    # chunked over `slab` rows so only a (slab, 3Hp) f32 intermediate is live.
    @pl.when(qi == 0)
    def _():
        nslabs = lp // slab
        if nslabs == 1:
            xs = x_ref[0].astype(jnp.bfloat16)                     # (Lp, Din)
            acc = jnp.dot(xs, wqkv_ref[...],
                          preferred_element_type=jnp.float32) + bqkv_ref[...]
            qkv_ref[...] = acc.astype(jnp.bfloat16)
        else:
            def project_slab(s, carry):
                r = pl.multiple_of(s * slab, slab)
                xs = x_ref[0, pl.ds(r, slab), :].astype(jnp.bfloat16)
                acc = jnp.dot(xs, wqkv_ref[...],
                              preferred_element_type=jnp.float32) + bqkv_ref[...]
                qkv_ref[pl.ds(r, slab), :] = acc.astype(jnp.bfloat16)
                return carry
            lax.fori_loop(0, nslabs, project_slab, 0)

    # Current query tile + full K/V from the resident bf16 scratch.
    row0 = pl.multiple_of(qi * tq, tq)
    q = qkv_ref[pl.ds(row0, tq), 0:hp]           # (TQ, Hp); 1/sqrt(H) pre-folded
    k = qkv_ref[:, hp:2 * hp]                    # (Lp, Hp)
    v = qkv_ref[:, 2 * hp:3 * hp]                # (Lp, Hp)

    # scores = q @ k^T without materializing a transpose.
    scores = lax.dot_general(q, k, (((1,), (1,)), ((), ())),
                             preferred_element_type=jnp.float32)   # (TQ, Lp)

    if has_mask:
        # Additive bias (0 / NEG_INF): one VPU add instead of compare+select.
        scores = scores + m_ref[0].astype(jnp.float32)
    if lp != valid_len:
        # Mask padded key columns in-kernel (no extra HBM stream).
        key_idx = lax.broadcasted_iota(jnp.int32, scores.shape, 1)
        scores = jnp.where(key_idx < valid_len, scores, jnp.float32(NEG_INF))

    # Softmax in f32; normalization deferred until after attn @ v.
    row_max = jnp.max(scores, axis=-1, keepdims=True)
    p = jnp.exp(scores - row_max)                                  # values in [0, 1]
    denom = jnp.sum(p, axis=-1, keepdims=True)

    ctx = jnp.dot(p.astype(jnp.bfloat16), v,
                  preferred_element_type=jnp.float32)              # (TQ, Hp)
    ctx = ctx * pl.reciprocal(denom, approx=True)                  # (TQ, Hp) scale

    out = jnp.dot(ctx.astype(jnp.bfloat16), wo_ref[...],
                  preferred_element_type=jnp.float32) + bo_ref[...]
    o_ref[0] = out.astype(o_ref.dtype)


def pack_params(params):
    """One-time transform of the f32 (in, out) weights into the fused / padded
    bf16 layout the kernel expects. Scale 1/sqrt(H) is folded into q."""
    wq, wk, wv = params["wq"], params["wk"], params["wv"]   # (Din, H)
    bq, bk, bv = params["bq"], params["bk"], params["bv"]   # (1, H)
    wo, bo = params["wo"], params["bo"]                     # (H, Dout), (1, Dout)

    Din, H = wq.shape
    Dout = wo.shape[1]
    Hp = _round_up(H, 128)
    Dp = _round_up(Dout, 128)
    inv_scale = 1.0 / math.sqrt(float(H))

    def pad_cols(w, b, cols, scale=1.0):
        wp = jnp.zeros((w.shape[0], cols), jnp.float32).at[:, :w.shape[1]].set(w * scale)
        bp = jnp.zeros((1, cols), jnp.float32).at[:, :b.shape[1]].set(b * scale)
        return wp, bp

    wq_p, bq_p = pad_cols(wq, bq, Hp, inv_scale)   # fold 1/sqrt(H) into q proj
    wk_p, bk_p = pad_cols(wk, bk, Hp)
    wv_p, bv_p = pad_cols(wv, bv, Hp)

    wqkv = jnp.concatenate([wq_p, wk_p, wv_p], axis=1).astype(jnp.bfloat16)  # (Din, 3Hp)
    bqkv = jnp.concatenate([bq_p, bk_p, bv_p], axis=1)                       # (1, 3Hp) f32

    wo_p = jnp.zeros((Hp, Dp), jnp.float32).at[:H, :Dout].set(wo).astype(jnp.bfloat16)
    bo_p = jnp.zeros((1, Dp), jnp.float32).at[:, :Dout].set(bo)

    return {"wqkv": wqkv, "bqkv": bqkv, "wo": wo_p, "bo": bo_p,
            "hid_dim": H, "hid_pad": Hp, "out_dim": Dout, "out_pad": Dp,
            "inp_dim": Din}


def _run_pallas(x_p, bias, packed, Lp, tq, slab, valid_len, vmem_limit, ce,
                buffer_weights):
    B, _, Din = x_p.shape
    Hp, Dp = packed["hid_pad"], packed["out_pad"]
    has_mask = bias is not None

    kernel = functools.partial(_pals_kernel, hp=Hp, tq=tq, slab=slab, lp=Lp,
                               valid_len=valid_len, has_mask=has_mask)

    # Weights/biases never change across grid steps -> single-buffer them.
    w_kwargs = {"pipeline_mode": pl.Buffered(1)} if buffer_weights else {}

    in_specs = [pl.BlockSpec((1, Lp, Din), lambda b, q: (b, 0, 0))]   # x, resident over q
    args = [x_p]
    if has_mask:
        in_specs.append(pl.BlockSpec((1, tq, Lp), lambda b, q: (b, q, 0)))
        args.append(bias)
    in_specs += [
        pl.BlockSpec((Din, 3 * Hp), lambda b, q: (0, 0), **w_kwargs),   # wqkv
        pl.BlockSpec((1, 3 * Hp), lambda b, q: (0, 0), **w_kwargs),     # bqkv
        pl.BlockSpec((Hp, Dp), lambda b, q: (0, 0), **w_kwargs),        # wo
        pl.BlockSpec((1, Dp), lambda b, q: (0, 0), **w_kwargs),         # bo
    ]
    args += [packed["wqkv"], packed["bqkv"], packed["wo"], packed["bo"]]

    return pl.pallas_call(
        kernel,
        out_shape=jax.ShapeDtypeStruct((B, Lp, Dp), x_p.dtype),
        grid_spec=pltpu.PrefetchScalarGridSpec(
            num_scalar_prefetch=0,
            grid=(B, Lp // tq),
            in_specs=in_specs,
            out_specs=pl.BlockSpec((1, tq, Dp), lambda b, q: (b, q, 0)),
            scratch_shapes=[pltpu.VMEM((Lp, 3 * Hp), jnp.bfloat16)],
        ),
        compiler_params=pltpu.CompilerParams(
            dimension_semantics=("parallel", "arbitrary"),
            vmem_limit_bytes=int(vmem_limit),
        ),
        cost_estimate=ce,
    )(*args)


def gpt2_pals_lite_forward(hidden_states, attention_mask, packed):
    """hidden_states: (B, L, Din) f32; attention_mask: (B, L, L) int/bool/float or None."""
    B, L, Din = hidden_states.shape
    Hp, Dp, Dout = packed["hid_pad"], packed["out_pad"], packed["out_dim"]

    Lp, tq = _seq_tiling(L)
    slab = _slab_size(Lp)
    has_mask = attention_mask is not None
    itemsize = hidden_states.dtype.itemsize

    cap = _vmem_cap_bytes()
    # Shrink tiles if the footprint estimate exceeds the per-chip VMEM cap.
    while (Lp > 512
           and _vmem_estimate(B, Lp, Din, Hp, Dp, tq, slab, has_mask,
                              itemsize, itemsize, True) > cap
           and (tq > 128 or slab > 128)):
        if tq > 128:
            tq //= 2
        else:
            slab //= 2
    vmem_limit = max(32 << 20,
                     min(_vmem_estimate(B, Lp, Din, Hp, Dp, tq, slab, has_mask,
                                        itemsize, itemsize, True), cap))

    x_p = hidden_states
    if Lp != L:
        x_p = jnp.pad(hidden_states, ((0, 0), (0, Lp - L), (0, 0)))

    bias = None
    if has_mask:
        # Additive bias in bf16 (half the HBM bytes of an f32 mask stream);
        # sequence padding is handled in-kernel via iota, so pad with zeros.
        bias = jnp.where(attention_mask == 0, NEG_INF, 0.0).astype(jnp.bfloat16)
        if Lp != L:
            bias = jnp.pad(bias, ((0, 0), (0, Lp - L), (0, Lp - L)))

    flops = (2 * B * Lp * Din * 3 * Hp          # QKV projection
             + 4 * B * Lp * Lp * Hp             # q@k^T and p@v
             + 2 * B * Lp * Hp * Dp)            # output projection
    bytes_accessed = (x_p.size * x_p.dtype.itemsize
                      + (bias.size * bias.dtype.itemsize if bias is not None else 0)
                      + packed["wqkv"].size * 2 + packed["wo"].size * 2
                      + packed["bqkv"].size * 4 + packed["bo"].size * 4
                      + B * Lp * Dp * itemsize)
    ce = pl.CostEstimate(flops=int(flops), transcendentals=int(B * Lp * Lp),
                         bytes_accessed=int(bytes_accessed))

    run = functools.partial(_run_pallas, x_p, bias, packed, Lp, tq, slab, L,
                            vmem_limit, ce)
    try:
        out = run(buffer_weights=True)
    except Exception:
        # Fallback if this runtime rejects pipeline_mode=pl.Buffered(1).
        out = run(buffer_weights=False)

    if Lp != L or Dp != Dout:
        out = out[:, :L, :Dout]
    return out


def init_params(key, inp_dim, hid_dim, out_dim):
    """Deterministic init mirroring the module: xavier_normal weights,
    PyTorch-default uniform biases. Weights stored as (in_dim, out_dim)."""
    ks = jax.random.split(key, 8)

    def xavier_normal(k, fan_in, fan_out):
        std = math.sqrt(2.0 / (fan_in + fan_out))
        return (std * jax.random.normal(k, (fan_in, fan_out))).astype(jnp.float32)

    def bias_uniform(k, fan_in, fan_out):
        bound = 1.0 / math.sqrt(fan_in)
        return jax.random.uniform(k, (1, fan_out), minval=-bound,
                                  maxval=bound).astype(jnp.float32)

    return {
        "wq": xavier_normal(ks[0], inp_dim, hid_dim),
        "bq": bias_uniform(ks[1], inp_dim, hid_dim),
        "wk": xavier_normal(ks[2], inp_dim, hid_dim),
        "bk": bias_uniform(ks[3], inp_dim, hid_dim),
        "wv": xavier_normal(ks[4], inp_dim, hid_dim),
        "bv": bias_uniform(ks[5], inp_dim, hid_dim),
        "wo": xavier_normal(ks[6], hid_dim, out_dim),
        "bo": bias_uniform(ks[7], hid_dim, out_dim),
    }


def _reference_forward(x, mask, params, hid_dim):
    """Pure-JAX f32 reference (same math as the PyTorch module, eval mode)."""
    q = x @ params["wq"] + params["bq"]
    k = x @ params["wk"] + params["bk"]
    v = x @ params["wv"] + params["bv"]
    scores = jnp.einsum("bld,bmd->blm", q / math.sqrt(hid_dim), k)
    if mask is not None:
        scores = jnp.where(mask == 0, NEG_INF, scores)
    attn = jax.nn.softmax(scores.astype(jnp.float32), axis=-1).astype(q.dtype)
    ctx = jnp.einsum("blm,bmd->bld", attn, v)
    return ctx @ params["wo"] + params["bo"]


if __name__ == "__main__":
    # Small shapes consistent with the module's (B, L, D) forward.
    B, L = 2, 8
    inp_dim, hid_dim, out_dim = 32, 16, 32

    key = jax.random.PRNGKey(0)
    k_x, k_m, k_p = jax.random.split(key, 3)

    x = jax.random.normal(k_x, (B, L, inp_dim), dtype=jnp.float32)
    # Compact binary attention mask (B, L, L); 0 -> masked out.
    attention_mask = (jax.random.uniform(k_m, (B, L, L)) > 0.2).astype(jnp.int8)

    params = init_params(k_p, inp_dim, hid_dim, out_dim)
    packed = pack_params(params)

    # Masked path.
    out = gpt2_pals_lite_forward(x, attention_mask, packed)
    out = jax.block_until_ready(out)
    ref = _reference_forward(x, attention_mask, params, hid_dim)
    assert out.shape == (B, L, out_dim)
    # bf16 MXU + approx reciprocal -> loosened tolerance vs f32 reference.
    assert jnp.allclose(out, ref, atol=5e-2, rtol=5e-2), "mismatch vs reference (mask)"

    # No-mask path (separate pallas_call variant; no mask stream at all).
    out_nm = gpt2_pals_lite_forward(x, None, packed)
    out_nm = jax.block_until_ready(out_nm)
    ref_nm = _reference_forward(x, None, params, hid_dim)
    assert jnp.allclose(out_nm, ref_nm, atol=5e-2, rtol=5e-2), "mismatch vs reference (no mask)"

    print("KERNEL_OK")
</pallas_src>

<mosaic_0001>
module attributes {stable_mosaic.version = 11 : i64} {
  func.func @_pals_kernel(%arg0: i32, %arg1: i32, %arg2: memref<1x8x32xf32, #tpu.memory_space<vmem>>, %arg3: memref<1x8x8xbf16, #tpu.memory_space<vmem>>, %arg4: memref<32x384xbf16, #tpu.memory_space<vmem>>, %arg5: memref<1x384xf32, #tpu.memory_space<vmem>>, %arg6: memref<128x128xbf16, #tpu.memory_space<vmem>>, %arg7: memref<1x128xf32, #tpu.memory_space<vmem>>, %arg8: memref<1x8x128xf32, #tpu.memory_space<vmem>>, %arg9: memref<8x384xbf16, #tpu.memory_space<vmem>>) attributes {dimension_semantics = [#tpu.dimension_semantics<parallel>, #tpu.dimension_semantics<arbitrary>], iteration_bounds = array<i64: 2, 1>, scalar_prefetch = 0 : i64, scratch_operands = 1 : i64, tpu.core_type = #tpu.core_type<tc>, window_params = [{transform_indices = @transform_0, window_bounds = array<i64: 1, 8, 32>}, {transform_indices = @transform_1, window_bounds = array<i64: 1, 8, 8>}, {pipeline_mode = #tpu.pipeline_mode<synchronous>, transform_indices = @transform_2, window_bounds = array<i64: 32, 384>}, {pipeline_mode = #tpu.pipeline_mode<synchronous>, transform_indices = @transform_3, window_bounds = array<i64: 1, 384>}, {pipeline_mode = #tpu.pipeline_mode<synchronous>, transform_indices = @transform_4, window_bounds = array<i64: 128, 128>}, {pipeline_mode = #tpu.pipeline_mode<synchronous>, transform_indices = @transform_5, window_bounds = array<i64: 1, 128>}, {transform_indices = @transform_6, window_bounds = array<i64: 1, 8, 128>}]} {
    %c0_i32 = arith.constant 0 : i32
    %0 = arith.cmpi eq, %arg1, %c0_i32 : i32
    %1 = arith.extui %0 : i1 to i32
    %c0_i32_0 = arith.constant 0 : i32
    %2 = arith.cmpi ne, %1, %c0_i32_0 : i32
    scf.if %2 {
      %c0_17 = arith.constant 0 : index
      %c0_18 = arith.constant 0 : index
      %c0_19 = arith.constant 0 : index
      %35 = vector.load %arg2[%c0_17, %c0_18, %c0_19] : memref<1x8x32xf32, #tpu.memory_space<vmem>>, vector<1x8x32xf32>
      %36 = vector.shape_cast %35 : vector<1x8x32xf32> to vector<8x32xf32>
      %37 = arith.truncf %36 : vector<8x32xf32> to vector<8x32xbf16>
      %c0_20 = arith.constant 0 : index
      %c0_21 = arith.constant 0 : index
      %38 = vector.load %arg4[%c0_20, %c0_21] : memref<32x384xbf16, #tpu.memory_space<vmem>>, vector<32x384xbf16>
      %cst_22 = arith.constant dense<0.000000e+00> : vector<8x384xf32>
      %39 = tpu.matmul %37, %38, %cst_22 {dimension_numbers = #tpu.dot_dimension_numbers<[1], [0], [0], [1], [0, 0, 1, 1], [], []>} : vector<8x32xbf16>, vector<32x384xbf16>, vector<8x384xf32> -> vector<8x384xf32>
      %c0_23 = arith.constant 0 : index
      %c0_24 = arith.constant 0 : index
      %40 = vector.load %arg5[%c0_23, %c0_24] : memref<1x384xf32, #tpu.memory_space<vmem>>, vector<1x384xf32>
      %41 = vector.broadcast %40 : vector<1x384xf32> to vector<8x384xf32>
      %42 = arith.addf %39, %41 : vector<8x384xf32>
      %43 = arith.truncf %42 : vector<8x384xf32> to vector<8x384xbf16>
      %c0_25 = arith.constant 0 : index
      %c0_26 = arith.constant 0 : index
      %44 = vector.load %arg9[%c0_25, %c0_26] : memref<8x384xbf16, #tpu.memory_space<vmem>>, vector<8x384xbf16>
      tpu.vector_store %arg9[%c0_25, %c0_26], %43 {strides = array<i32>} : memref<8x384xbf16, #tpu.memory_space<vmem>>, vector<8x384xbf16>,
    } else {
    }
    %c8_i32 = arith.constant 8 : i32
    %3 = arith.muli %arg1, %c8_i32 : i32
    %4 = tpu.assume_multiple %3, 8 : i32
    %5 = arith.index_cast %4 : i32 to index
    %c0 = arith.constant 0 : index
    %6 = vector.load %arg9[%5, %c0] : memref<8x384xbf16, #tpu.memory_space<vmem>>, vector<8x128xbf16>
    %c0_1 = arith.constant 0 : index
    %c128 = arith.constant 128 : index
    %7 = vector.load %arg9[%c0_1, %c128] : memref<8x384xbf16, #tpu.memory_space<vmem>>, vector<8x128xbf16>
    %c0_2 = arith.constant 0 : index
    %c256 = arith.constant 256 : index
    %8 = vector.load %arg9[%c0_2, %c256] : memref<8x384xbf16, #tpu.memory_space<vmem>>, vector<8x128xbf16>
    %cst = arith.constant dense<0.000000e+00> : vector<8x8xf32>
    %9 = tpu.matmul %6, %7, %cst {dimension_numbers = #tpu.dot_dimension_numbers<[1], [1], [0], [0], [0, 0, 1, 0], [], []>} : vector<8x128xbf16>, vector<8x128xbf16>, vector<8x8xf32> -> vector<8x8xf32>
    %c0_3 = arith.constant 0 : index
    %c0_4 = arith.constant 0 : index
    %c0_5 = arith.constant 0 : index
    %10 = vector.load %arg3[%c0_3, %c0_4, %c0_5] : memref<1x8x8xbf16, #tpu.memory_space<vmem>>, vector<1x8x8xbf16>
    %11 = vector.shape_cast %10 : vector<1x8x8xbf16> to vector<8x8xbf16>
    %12 = arith.extf %11 : vector<8x8xbf16> to vector<8x8xf32>
    %13 = arith.addf %9, %12 : vector<8x8xf32>
    %cst_6 = arith.constant dense<0xFF800000> : vector<8xf32>
    %14 = vector.multi_reduction <maximumf>, %13, %cst_6 [1] : vector<8x8xf32> to vector<8xf32>
    %15 = vector.shape_cast %14 : vector<8xf32> to vector<8x1xf32>
    %16 = vector.broadcast %15 : vector<8x1xf32> to vector<8x8xf32>
    %17 = arith.subf %13, %16 : vector<8x8xf32>
    %18 = math.exp %17 : vector<8x8xf32>
    %cst_7 = arith.constant dense<0.000000e+00> : vector<8xf32>
    %19 = vector.multi_reduction <add>, %18, %cst_7 [1] : vector<8x8xf32> to vector<8xf32>
    %20 = vector.shape_cast %19 : vector<8xf32> to vector<8x1xf32>
    %21 = arith.truncf %18 : vector<8x8xf32> to vector<8x8xbf16>
    %cst_8 = arith.constant dense<0.000000e+00> : vector<8x128xf32>
    %22 = tpu.matmul %21, %8, %cst_8 {dimension_numbers = #tpu.dot_dimension_numbers<[1], [0], [0], [1], [0, 0, 1, 1], [], []>} : vector<8x8xbf16>, vector<8x128xbf16>, vector<8x128xf32> -> vector<8x128xf32>
    %23 = tpu.reciprocal %20 {approx = true} : vector<8x1xf32> -> vector<8x1xf32>
    %24 = vector.broadcast %23 : vector<8x1xf32> to vector<8x128xf32>
    %25 = arith.mulf %22, %24 : vector<8x128xf32>
    %26 = arith.truncf %25 : vector<8x128xf32> to vector<8x128xbf16>
    %c0_9 = arith.constant 0 : index
    %c0_10 = arith.constant 0 : index
    %27 = vector.load %arg6[%c0_9, %c0_10] : memref<128x128xbf16, #tpu.memory_space<vmem>>, vector<128x128xbf16>
    %cst_11 = arith.constant dense<0.000000e+00> : vector<8x128xf32>
    %28 = tpu.matmul %26, %27, %cst_11 {dimension_numbers = #tpu.dot_dimension_numbers<[1], [0], [0], [1], [0, 0, 1, 1], [], []>} : vector<8x128xbf16>, vector<128x128xbf16>, vector<8x128xf32> -> vector<8x128xf32>
    %c0_12 = arith.constant 0 : index
    %c0_13 = arith.constant 0 : index
    %29 = vector.load %arg7[%c0_12, %c0_13] : memref<1x128xf32, #tpu.memory_space<vmem>>, vector<1x128xf32>
    %30 = vector.broadcast %29 : vector<1x128xf32> to vector<8x128xf32>
    %31 = arith.addf %28, %30 : vector<8x128xf32>
    %c0_14 = arith.constant 0 : index
    %c0_15 = arith.constant 0 : index
    %c0_16 = arith.constant 0 : index
    %32 = vector.load %arg8[%c0_14, %c0_15, %c0_16] : memref<1x8x128xf32, #tpu.memory_space<vmem>>, vector<1x8x128xf32>
    %33 = vector.shape_cast %32 : vector<1x8x128xf32> to vector<8x128xf32>
    %34 = vector.shape_cast %31 : vector<8x128xf32> to vector<1x8x128xf32>
    tpu.vector_store %arg8[%c0_14, %c0_15, %c0_16], %34 {strides = array<i32>} : memref<1x8x128xf32, #tpu.memory_space<vmem>>, vector<1x8x128xf32>,
    return
  }
  func.func @transform_0(%arg0: i32, %arg1: i32) -> (i32, i32, i32) {
    %c0_i32 = arith.constant 0 : i32
    %c0_i32_0 = arith.constant 0 : i32
    %c0_i32_1 = arith.constant 0 : i32
    return %arg0, %c0_i32, %c0_i32_0 : i32, i32, i32
  }
  func.func @transform_1(%arg0: i32, %arg1: i32) -> (i32, i32, i32) {
    %c0_i32 = arith.constant 0 : i32
    %c0_i32_0 = arith.constant 0 : i32
    return %arg0, %arg1, %c0_i32 : i32, i32, i32
  }
  func.func @transform_2(%arg0: i32, %arg1: i32) -> (i32, i32) {
    %c0_i32 = arith.constant 0 : i32
    %c0_i32_0 = arith.constant 0 : i32
    %c0_i32_1 = arith.constant 0 : i32
    return %c0_i32, %c0_i32_0 : i32, i32
  }
  func.func @transform_3(%arg0: i32, %arg1: i32) -> (i32, i32) {
    %c0_i32 = arith.constant 0 : i32
    %c0_i32_0 = arith.constant 0 : i32
    %c0_i32_1 = arith.constant 0 : i32
    return %c0_i32, %c0_i32_0 : i32, i32
  }
  func.func @transform_4(%arg0: i32, %arg1: i32) -> (i32, i32) {
    %c0_i32 = arith.constant 0 : i32
    %c0_i32_0 = arith.constant 0 : i32
    %c0_i32_1 = arith.constant 0 : i32
    return %c0_i32, %c0_i32_0 : i32, i32
  }
  func.func @transform_5(%arg0: i32, %arg1: i32) -> (i32, i32) {
    %c0_i32 = arith.constant 0 : i32
    %c0_i32_0 = arith.constant 0 : i32
    %c0_i32_1 = arith.constant 0 : i32
    return %c0_i32, %c0_i32_0 : i32, i32
  }
  func.func @transform_6(%arg0: i32, %arg1: i32) -> (i32, i32, i32) {
    %c0_i32 = arith.constant 0 : i32
    %c0_i32_0 = arith.constant 0 : i32
    return %arg0, %arg1, %c0_i32 : i32, i32, i32
  }
}

module attributes {stable_mosaic.version = 11 : i64} {
  func.func @_pals_kernel(%arg0: i32, %arg1: i32, %arg2: memref<1x8x32xf32, #tpu.memory_space<vmem>>, %arg3: memref<1x8x8xbf16, #tpu.memory_space<vmem>>, %arg4: memref<32x384xbf16, #tpu.memory_space<vmem>>, %arg5: memref<1x384xf32, #tpu.memory_space<vmem>>, %arg6: memref<128x128xbf16, #tpu.memory_space<vmem>>, %arg7: memref<1x128xf32, #tpu.memory_space<vmem>>, %arg8: memref<1x8x128xf32, #tpu.memory_space<vmem>>, %arg9: memref<8x384xbf16, #tpu.memory_space<vmem>>) attributes {dimension_semantics = [#tpu.dimension_semantics<parallel>, #tpu.dimension_semantics<arbitrary>], iteration_bounds = array<i64: 2, 1>, scalar_prefetch = 0 : i64, scratch_operands = 1 : i64, tpu.core_type = #tpu.core_type<tc>, window_params = [{transform_indices = @transform_0, window_bounds = array<i64: 1, 8, 32>}, {transform_indices = @transform_1, window_bounds = array<i64: 1, 8, 8>}, {pipeline_mode = #tpu.pipeline_mode<synchronous>, transform_indices = @transform_2, window_bounds = array<i64: 32, 384>}, {pipeline_mode = #tpu.pipeline_mode<synchronous>, transform_indices = @transform_3, window_bounds = array<i64: 1, 384>}, {pipeline_mode = #tpu.pipeline_mode<synchronous>, transform_indices = @transform_4, window_bounds = array<i64: 128, 128>}, {pipeline_mode = #tpu.pipeline_mode<synchronous>, transform_indices = @transform_5, window_bounds = array<i64: 1, 128>}, {transform_indices = @transform_6, window_bounds = array<i64: 1, 8, 128>}]} {
    %c0_i32 = arith.constant 0 : i32
    %0 = arith.cmpi eq, %arg1, %c0_i32 : i32
    %1 = arith.extui %0 : i1 to i32
    %c0_i32_0 = arith.constant 0 : i32
    %2 = arith.cmpi ne, %1, %c0_i32_0 : i32
    scf.if %2 {
      %c0_17 = arith.constant 0 : index
      %c0_18 = arith.constant 0 : index
      %c0_19 = arith.constant 0 : index
      %35 = vector.load %arg2[%c0_17, %c0_18, %c0_19] : memref<1x8x32xf32, #tpu.memory_space<vmem>>, vector<1x8x32xf32>
      %36 = vector.shape_cast %35 : vector<1x8x32xf32> to vector<8x32xf32>
      %37 = arith.truncf %36 : vector<8x32xf32> to vector<8x32xbf16>
      %c0_20 = arith.constant 0 : index
      %c0_21 = arith.constant 0 : index
      %38 = vector.load %arg4[%c0_20, %c0_21] : memref<32x384xbf16, #tpu.memory_space<vmem>>, vector<32x384xbf16>
      %cst_22 = arith.constant dense<0.000000e+00> : vector<8x384xf32>
      %39 = tpu.matmul %37, %38, %cst_22 {dimension_numbers = #tpu.dot_dimension_numbers<[1], [0], [0], [1], [0, 0, 1, 1], [], []>} : vector<8x32xbf16>, vector<32x384xbf16>, vector<8x384xf32> -> vector<8x384xf32>
      %c0_23 = arith.constant 0 : index
      %c0_24 = arith.constant 0 : index
      %40 = vector.load %arg5[%c0_23, %c0_24] : memref<1x384xf32, #tpu.memory_space<vmem>>, vector<1x384xf32>
      %41 = vector.broadcast %40 : vector<1x384xf32> to vector<8x384xf32>
      %42 = arith.addf %39, %41 : vector<8x384xf32>
      %43 = arith.truncf %42 : vector<8x384xf32> to vector<8x384xbf16>
      %c0_25 = arith.constant 0 : index
      %c0_26 = arith.constant 0 : index
      %44 = vector.load %arg9[%c0_25, %c0_26] : memref<8x384xbf16, #tpu.memory_space<vmem>>, vector<8x384xbf16>
      tpu.vector_store %arg9[%c0_25, %c0_26], %43 {strides = array<i32>} : memref<8x384xbf16, #tpu.memory_space<vmem>>, vector<8x384xbf16>,
    } else {
    }
    %c8_i32 = arith.constant 8 : i32
    %3 = arith.muli %arg1, %c8_i32 : i32
    %4 = tpu.assume_multiple %3, 8 : i32
    %5 = arith.index_cast %4 : i32 to index
    %c0 = arith.constant 0 : index
    %6 = vector.load %arg9[%5, %c0] : memref<8x384xbf16, #tpu.memory_space<vmem>>, vector<8x128xbf16>
    %c0_1 = arith.constant 0 : index
    %c128 = arith.constant 128 : index
    %7 = vector.load %arg9[%c0_1, %c128] : memref<8x384xbf16, #tpu.memory_space<vmem>>, vector<8x128xbf16>
    %c0_2 = arith.constant 0 : index
    %c256 = arith.constant 256 : index
    %8 = vector.load %arg9[%c0_2, %c256] : memref<8x384xbf16, #tpu.memory_space<vmem>>, vector<8x128xbf16>
    %cst = arith.constant dense<0.000000e+00> : vector<8x8xf32>
    %9 = tpu.matmul %6, %7, %cst {dimension_numbers = #tpu.dot_dimension_numbers<[1], [1], [0], [0], [0, 0, 1, 0], [], []>} : vector<8x128xbf16>, vector<8x128xbf16>, vector<8x8xf32> -> vector<8x8xf32>
    %c0_3 = arith.constant 0 : index
    %c0_4 = arith.constant 0 : index
    %c0_5 = arith.constant 0 : index
    %10 = vector.load %arg3[%c0_3, %c0_4, %c0_5] : memref<1x8x8xbf16, #tpu.memory_space<vmem>>, vector<1x8x8xbf16>
    %11 = vector.shape_cast %10 : vector<1x8x8xbf16> to vector<8x8xbf16>
    %12 = arith.extf %11 : vector<8x8xbf16> to vector<8x8xf32>
    %13 = arith.addf %9, %12 : vector<8x8xf32>
    %cst_6 = arith.constant dense<0xFF800000> : vector<8xf32>
    %14 = vector.multi_reduction <maximumf>, %13, %cst_6 [1] : vector<8x8xf32> to vector<8xf32>
    %15 = vector.shape_cast %14 : vector<8xf32> to vector<8x1xf32>
    %16 = vector.broadcast %15 : vector<8x1xf32> to vector<8x8xf32>
    %17 = arith.subf %13, %16 : vector<8x8xf32>
    %18 = math.exp %17 : vector<8x8xf32>
    %cst_7 = arith.constant dense<0.000000e+00> : vector<8xf32>
    %19 = vector.multi_reduction <add>, %18, %cst_7 [1] : vector<8x8xf32> to vector<8xf32>
    %20 = vector.shape_cast %19 : vector<8xf32> to vector<8x1xf32>
    %21 = arith.truncf %18 : vector<8x8xf32> to vector<8x8xbf16>
    %cst_8 = arith.constant dense<0.000000e+00> : vector<8x128xf32>
    %22 = tpu.matmul %21, %8, %cst_8 {dimension_numbers = #tpu.dot_dimension_numbers<[1], [0], [0], [1], [0, 0, 1, 1], [], []>} : vector<8x8xbf16>, vector<8x128xbf16>, vector<8x128xf32> -> vector<8x128xf32>
    %23 = tpu.reciprocal %20 {approx = true} : vector<8x1xf32> -> vector<8x1xf32>
    %24 = vector.broadcast %23 : vector<8x1xf32> to vector<8x128xf32>
    %25 = arith.mulf %22, %24 : vector<8x128xf32>
    %26 = arith.truncf %25 : vector<8x128xf32> to vector<8x128xbf16>
    %c0_9 = arith.constant 0 : index
    %c0_10 = arith.constant 0 : index
    %27 = vector.load %arg6[%c0_9, %c0_10] : memref<128x128xbf16, #tpu.memory_space<vmem>>, vector<128x128xbf16>
    %cst_11 = arith.constant dense<0.000000e+00> : vector<8x128xf32>
    %28 = tpu.matmul %26, %27, %cst_11 {dimension_numbers = #tpu.dot_dimension_numbers<[1], [0], [0], [1], [0, 0, 1, 1], [], []>} : vector<8x128xbf16>, vector<128x128xbf16>, vector<8x128xf32> -> vector<8x128xf32>
    %c0_12 = arith.constant 0 : index
    %c0_13 = arith.constant 0 : index
    %29 = vector.load %arg7[%c0_12, %c0_13] : memref<1x128xf32, #tpu.memory_space<vmem>>, vector<1x128xf32>
    %30 = vector.broadcast %29 : vector<1x128xf32> to vector<8x128xf32>
    %31 = arith.addf %28, %30 : vector<8x128xf32>
    %c0_14 = arith.constant 0 : index
    %c0_15 = arith.constant 0 : index
    %c0_16 = arith.constant 0 : index
    %32 = vector.load %arg8[%c0_14, %c0_15, %c0_16] : memref<1x8x128xf32, #tpu.memory_space<vmem>>, vector<1x8x128xf32>
    %33 = vector.shape_cast %32 : vector<1x8x128xf32> to vector<8x128xf32>
    %34 = vector.shape_cast %31 : vector<8x128xf32> to vector<1x8x128xf32>
    tpu.vector_store %arg8[%c0_14, %c0_15, %c0_16], %34 {strides = array<i32>} : memref<1x8x128xf32, #tpu.memory_space<vmem>>, vector<1x8x128xf32>,
    return
  }
  func.func @transform_0(%arg0: i32, %arg1: i32) -> (i32, i32, i32) {
    %c0_i32 = arith.constant 0 : i32
    %c0_i32_0 = arith.constant 0 : i32
    %c0_i32_1 = arith.constant 0 : i32
    return %arg0, %c0_i32, %c0_i32_0 : i32, i32, i32
  }
  func.func @transform_1(%arg0: i32, %arg1: i32) -> (i32, i32, i32) {
    %c0_i32 = arith.constant 0 : i32
    %c0_i32_0 = arith.constant 0 : i32
    return %arg0, %arg1, %c0_i32 : i32, i32, i32
  }
  func.func @transform_2(%arg0: i32, %arg1: i32) -> (i32, i32) {
    %c0_i32 = arith.constant 0 : i32
    %c0_i32_0 = arith.constant 0 : i32
    %c0_i32_1 = arith.constant 0 : i32
    return %c0_i32, %c0_i32_0 : i32, i32
  }
  func.func @transform_3(%arg0: i32, %arg1: i32) -> (i32, i32) {
    %c0_i32 = arith.constant 0 : i32
    %c0_i32_0 = arith.constant 0 : i32
    %c0_i32_1 = arith.constant 0 : i32
    return %c0_i32, %c0_i32_0 : i32, i32
  }
  func.func @transform_4(%arg0: i32, %arg1: i32) -> (i32, i32) {
    %c0_i32 = arith.constant 0 : i32
    %c0_i32_0 = arith.constant 0 : i32
    %c0_i32_1 = arith.constant 0 : i32
    return %c0_i32, %c0_i32_0 : i32, i32
  }
  func.func @transform_5(%arg0: i32, %arg1: i32) -> (i32, i32) {
    %c0_i32 = arith.constant 0 : i32
    %c0_i32_0 = arith.constant 0 : i32
    %c0_i32_1 = arith.constant 0 : i32
    return %c0_i32, %c0_i32_0 : i32, i32
  }
  func.func @transform_6(%arg0: i32, %arg1: i32) -> (i32, i32, i32) {
    %c0_i32 = arith.constant 0 : i32
    %c0_i32_0 = arith.constant 0 : i32
    return %arg0, %arg1, %c0_i32 : i32, i32, i32
  }
}

</mosaic_0001>

<bundles_post_ra>
// kernel: tpu_custom_call.1
= control target key start
LH: loop header
LB: loop body
LE: loop exit
PB: predicated region body
PF: predicated region fallthrough
CT: control target
= control target key end

     0   :  { %s1584_s0 = inlined_call_operand.hbm [shape: f32[2,8,32], index: 0, kind: input, shape index: {}]   ;;  %s1585_s1 = inlined_call_operand.hbm [shape: bf16[2,8,8], index: 1, kind: input, shape index: {}]   ;;  %s1586_s2 = inlined_call_operand.hbm [shape: bf16[32,384], index: 2, kind: input, shape index: {}]   ;;  %s1587_s3 = inlined_call_operand.vmem [shape: f32[1,384], index: 3, kind: input, shape index: {}]   ;;  %s1588_s4 = inlined_call_operand.hbm [shape: bf16[128,128], index: 4, kind: input, shape index: {}]   ;;  %s1589_s5 = inlined_call_operand.vmem [shape: f32[1,128], index: 5, kind: input, shape index: {}]   ;;  %s1590_s6 = inlined_call_operand.hbm [shape: f32[2,8,128], index: 6, kind: output, shape index: {}]  }
   0x1   :  { %1594 = sst [smem:[#allocation20_spill]] %s1584_s0 }
   0x2   :  { %1595 = sst [smem:[#allocation21_spill]] %s1586_s2 }
   0x3   :  { %1596 = sst [smem:[#allocation22_spill]] %s1588_s4 }
   0x4   :  { %11 = vsyncpa [#allocation4], 0 }
   0x5   :  { %13 = vsyncpa [#allocation4 + $0x1], 0 }
   0x6   :  { %14 = vsyncpa [#allocation7], 0 }
   0x7   :  { %16 = vsyncpa [#allocation7 + $0x1], 0 }
   0x8   :  { %17 = vsyncpa [#allocation10], 0 }
   0x9   :  { %18 = vsyncpa [#allocation5], 0 }
   0xa   :  { %20 = vsyncpa [#allocation5 + $0x1], 0  ;;  %s1339_s21 = smov 0   ;;  %s1341_s22 = smov 0  }
   0xb   :  { %s1343_s23 = smov 0   ;;  %s1345_s24 = smov 0  }
   0xc   :  { %s1347_s25 = smov 0   ;;  %s1349_s26 = smov 0  }
   0xd LB: > { %1597 = sst [smem:[#allocation17_spill]] %s1278_s23  ;;  %s1370_s27 = sadd.s32 4294967295, %s1290_s26   ;;  %s1290_s26 = sphi %s1349_s26, %s26_s26   ;;  %s1286_s25 = sphi %s1347_s25, %s1622_s25   ;;  %s1282_s24 = sphi %s1345_s24, %s1621_s24   ;;  %s1278_s23 = sphi %s1343_s23, %s1617_s23   ;;  %s1274_s22 = sphi %s1341_s22, %s1620_s22   ;;  %s1270_s21 = sphi %s1339_s21, %s1619_s21  }
   0xe   : > { %s878_s28 = sadd.s32 4294967294, %s1290_s26   ;;  %p58_p0 = scmp.ne.s32.totalorder %s1274_s22, %s1270_s21 }
   0xf   : > { %p1591_p1 = scmp.eq.s32.totalorder %s1370_s27, 0  ;;  %p202_p3 = scmp.eq.s32.totalorder %s878_s28, 1 }
  0x10   : > { %p879_p5 = scmp.ge.s32.totalorder %s1290_s26, 1  ;;  %p209_p7 = scmp.lt.s32.totalorder %s1290_s26, 3 }
  0x11   : > { %p1379_p4 = por %p1591_p1, %p58_p0  ;;  %p1384_p6 = por %p202_p3, %p58_p0 }
  0x12   : > { %p1389_p8 = pnand %p879_p5, %p209_p7  ;;  %s1292_s8 = smov [#allocation8]  }
  0x13   : > { %s1599_s30 = scalar_select %p1384_p6, 1, 0 }
  0x14   : > { %s221_s9 = sshll.u32 %s1292_s8, 4  ;;  %p989_p9 = pneg %p1389_p8  ;;  %s222_s9 = int_to_ptr.vmem [resolvable:$true] %s221_s9 }
  0x15   : > { %s1293_s11 = smov [#allocation9]   ;;  %s1101_s13 = scalar_lea.vmem %s222_s9, 768 }
  0x16   : > { %p1398_p11 = pnand %p989_p9, %p1591_p1  ;;  %s237_s12 = sshll.u32 %s1293_s11, 4  ;;  %s238_s12 = int_to_ptr.vmem [resolvable:$true] %s237_s12 }
  0x17   : > { %p1102_p13 = scmp.ne.s32.totalorder %s222_s9, %s1101_s13  ;;  %p1109_p5 = scmp.lt.s32.totalorder %s222_s9, %s222_s9 }
  0x18   : > { %p1092_p12 = pneg %p1398_p11  ;;  %p1110_p7 = scmp.lt.s32.totalorder %s1101_s13, %s1101_s13 }
  0x1a   : > { %p1104_p0 = pnand %p1102_p13, %p1092_p12  ;;  %p1111_p10 = por %p1110_p7, %p1109_p5 }
  0x1c   : > { %p1105_p3 = pneg %p1104_p0 }
  0x1e   : > { %p1112_p9 = pnand %p1111_p10, %p1105_p3 }
  0x20   : > { %1115 = shalt.err (!%p1112_p9)
}
  0x21   : > { %s1294_s14 = smov 192   ;;  %s1295_s15 = smov 12  }
  0x22   : > { %s1602_s2 = sld [smem:[#allocation21_spill]]  ;;  %s1127_s18 = scalar_lea.vmem %s238_s12, 1024 }
  0x23   : > { %p1128_p1 = scmp.ne.s32.totalorder %s238_s12, %s1127_s18  ;;  %p1135_p2 = scmp.lt.s32.totalorder %s238_s12, %s238_s12 }
  0x24   : > { %p1136_p6 = scmp.lt.s32.totalorder %s1127_s18, %s1127_s18 }
  0x25   : > { %p1130_p13 = pnand %p1128_p1, %p1092_p12 }
  0x26   : > { %p1137_p5 = por %p1136_p6, %p1135_p2 }
  0x27   : > { %p1131_p0 = pneg %p1130_p13 }
  0x28   : > { %992 = dma.hbm_to_vmem [thread:$0]  (!%p1398_p11), %s1602_s2, 768, %s222_s9, [#allocation7], %s1294_s14, %s1294_s14, %s1295_s15  }
  0x29   : > { %p1138_p10 = pnand %p1137_p5, %p1131_p0 }
  0x2b   : > { %1141 = shalt.err (!%p1138_p10)
}
  0x2c   : > { %s1296_s19 = smov 64   ;;  %s1297_s20 = smov 4  }
  0x2d   : > { %s1603_s4 = sld [smem:[#allocation22_spill]]  ;;  %s38_s9 = sadd.s32 1, %s1286_s25 }
  0x2e   : > { %s45_s11 = sadd.s32 1, %s1278_s23  ;;  %p40_p1 = scmp.ge.s32.totalorder %s38_s9, 2 }
  0x2f   : > { %p52_p2 = scmp.ne.s32.totalorder %s1278_s23, %s1274_s22  ;;  %p53_p6 = scmp.eq.s32.totalorder %s1290_s26, 0 }
  0x30   : > { %p1009_p12 = scmp.lt.s32.totalorder %s1290_s26, 2  ;;  %s1624_s9 = smov (%p40_p1, %s38_s9), 0 }
  0x31   : > { %1604 = sst [smem:[#allocation18_spill]] %s1624_s9  ;;  %p54_p3 = por %p53_p6, %p52_p2 }
  0x32   : > { %p1605_p7 = scmp.eq.s32.totalorder %s1370_s27, 1  ;;  %s42_s13 = ssub.s32 %s1286_s25, %s1624_s9 }
  0x33   : > { %995 = dma.hbm_to_vmem [thread:$0]  (!%p1398_p11), %s1603_s4, 1024, %s238_s12, [#allocation10], %s1296_s19, %s1296_s19, %s1297_s20  }
  0x34   : > { %p1430_p9 = por %p1605_p7, %p52_p2  ;;  %s1437_s14 = sand.u32 1, %s1278_s23  }
  0x35   : > { %p43_p11 = scmp.eq.s32.totalorder %s42_s13, 0  ;;  %s883_s12 = sshll.u32 %s1437_s14, 3 }
  0x36   : > { %s884_s15 = sshll.u32 %s1286_s25, 7  ;;  %s1608_s0 = sld [smem:[#allocation20_spill]] }
  0x37   : > { %s1442_s16 = scalar_select %p43_p11, %s1278_s23, %s45_s11  }
  0x38   : > { %s258_s20 = scalar_lea.vmem [#allocation3], %s883_s12  ;;  %p1449_p13 = pnand %p1009_p12, %p54_p3 }
  0x39   : > { %1607 = sst [smem:[#allocation19_spill]] %s1442_s16  ;;  %s265_s28 = sshll.u32 %s258_s20, 4  ;;  %s266_s28 = int_to_ptr.vmem [resolvable:$true] %s265_s28 }
  0x3a   : > { %s272_s2 = sand.u32 1, %s1290_s26   ;;  %s255_s13 = scalar_lea.sflag [#allocation4], %s1437_s14 }
  0x3b   : > { %p1144_p0 = pneg %p1449_p13  ;;  %s1155_s11 = scalar_lea.vmem %s266_s28, 128 }
  0x3c   : > { %s263_s19 = scalar_lea.hbm %s1608_s0, %s884_s15  ;;  %p1156_p5 = scmp.ne.s32.totalorder %s266_s28, %s1155_s11 }
  0x3d   : > { %s1298_s12 = smov [#allocation3]  }
  0x3e   : > { %p1158_p10 = pnand %p1156_p5, %p1144_p0  ;;  %s1160_s15 = sshll.u32 %s1298_s12, 4  ;;  %s1161_s15 = int_to_ptr.vmem [resolvable:$false] %s1160_s15 }
  0x3f   : > { %s1162_s17 = scalar_lea.vmem %s1161_s15, 256  ;;  %p1163_p2 = scmp.lt.s32.totalorder %s266_s28, %s1161_s15 }
  0x40   : > { %p1159_p1 = pneg %p1158_p10  ;;  %p1164_p6 = scmp.lt.s32.totalorder %s1162_s17, %s1155_s11 }
  0x42   : > { %p1165_p12 = por %p1164_p6, %p1163_p2 }
  0x44   : > { %p1166_p3 = pnand %p1165_p12, %p1159_p1 }
  0x46   : > { %1169 = shalt.err (!%p1166_p3)
}
  0x47   : > { %999 = dma.hbm_to_vmem [thread:$0]  (!%p1449_p13), %s263_s19, 128, %s266_s28, %s255_s13  }
  0x48   : > { %s885_s18 = sshll.u32 %s1437_s14, 2  ;;  %s886_s20 = sshll.u32 %s1286_s25, 6 }
  0x49   : > { %s282_s9 = scalar_lea.hbm %s1585_s1, %s886_s20  ;;  %s276_s12 = scalar_lea.vmem [#allocation6], %s885_s18 }
  0x4a   : > { %s284_s16 = sshll.u32 %s276_s12, 4  ;;  %s273_s15 = scalar_lea.sflag [#allocation7], %s272_s2  ;;  %s285_s16 = int_to_ptr.vmem [resolvable:$true] %s284_s16 }
  0x4b   : > { %s1183_s11 = scalar_lea.vmem %s285_s16, 64  ;;  %s1299_s17 = smov [#allocation6]  }
  0x4c   : > { %p1184_p7 = scmp.ne.s32.totalorder %s285_s16, %s1183_s11  ;;  %s1188_s23 = sshll.u32 %s1299_s17, 4  ;;  %s1189_s23 = int_to_ptr.vmem [resolvable:$false] %s1188_s23 }
  0x4d   : > { %s1190_s19 = scalar_lea.vmem %s1189_s23, 128  ;;  %p1191_p10 = scmp.lt.s32.totalorder %s285_s16, %s1189_s23 }
  0x4e   : > { %p1186_p11 = pnand %p1184_p7, %p1144_p0  ;;  %p1192_p1 = scmp.lt.s32.totalorder %s1190_s19, %s1183_s11 }
  0x50   : > { %p1187_p5 = pneg %p1186_p11  ;;  %p1193_p2 = por %p1192_p1, %p1191_p10 }
  0x52   : > { %p1194_p6 = pnand %p1193_p2, %p1187_p5 }
  0x54   : > { %1197 = shalt.err (!%p1194_p6)
}
  0x55   : > { %1002 = dma.hbm_to_vmem [thread:$0]  (!%p1449_p13), %s282_s9, 64, %s285_s16, %s273_s15  }
  0x56   : > { %293 = sbr.rel (%p1389_p8) target bundleno = 1084 (0x43c), region = 44  ;;  %s1475_s0 = sand.u32 (!%p1389_p8), 1, %s1274_s22  }
  0x57   : > { %s888_s2 = sshll.u32 (!%p1389_p8), %s1475_s0, 3  ;;  %s296_s4 = scalar_lea.sflag (!%p1389_p8), [#allocation4], %s1475_s0 }
  0x58   : > { %s299_s23 = scalar_lea.vmem (!%p1389_p8), [#allocation3], %s888_s2 }
  0x5b   : > { %1249 = dma.done.wait (%p1379_p4), %s296_s4, 128  }
  0x5c   : > { %1251 = vsyncadd (%p1379_p4), %s296_s4, 4294967168  ;;  %s304_s7 = sand.u32 1, %s1370_s27   ;;  %s889_s9 = sshll.u32 %s1475_s0, 2 }
  0x5d   : > { %s305_s14 = scalar_lea.sflag [#allocation7], %s304_s7  ;;  %s1487_s16 = scalar_lea.vmem [#allocation6], %s889_s9 }
  0x5e   : > { %1253 = dma.done.wait (%p1379_p4), %s305_s14, 64  }
  0x5f   : > { %1255 = vsyncadd (%p1379_p4), %s305_s14, 4294967232  ;;  %p1610_p8 = scmp.eq.s32.totalorder %s1370_s27, 0 }
  0x61   : > { %1257 = dma.done.wait (%p1610_p8), [#allocation7], 768   ;;  %p1611_p13 = pmov %p1610_p8 }
  0x62   : > { %p1612_p0 = pmov %p1610_p8 }
  0x63   : > { %1259 = vsyncadd (%p1611_p13), [#allocation7], 4294966528 }
  0x64   : > { %1261 = dma.done.wait (%p1612_p0), [#allocation10], 1024   ;;  %p1613_p12 = pmov %p1612_p0 }
  0x65   : > { %v1300_v0 = vmov 0   ;;  %v1070_v1 = vld [vmem:[#allocation8 + $0x1c] ss:$12 sps:$4 sm:$0xff]   ;;  %v1072_v2 = vld [vmem:[#allocation8 + $0x18] ss:$12 sps:$4 sm:$0xff]   ;;  %vm414_vm0 = vcmask 261120   ;;  %v367_v10 = vlaneseq }
  0x66   : > { %1263 = vsyncadd (%p1613_p12), [#allocation10], 4294966272  ;;  %450 = vmatprep.mubr.bf16.mxu1 %v1300_v0  ;;  %430 = vmatprep.subr.bf16.mxu1 %v1070_v1  ;;  %v1073_v3 = vld [vmem:[#allocation8 + $0x4] ss:$12 sps:$4 sm:$0xff]   ;;  %v1075_v4 = vld [vmem:[#allocation8] ss:$12 sps:$4 sm:$0xff]  }
  0x67   : > { %431 = vmatpush1.bf16.msra.mxu1 %v1072_v2  ;;  %v355_v5 = vld [vmem:[%s299_s23] sm:$0xff]  ;;  %v1301_v8 = vmov 0.0   ;;  %vm1302_vm1 = vmmov 0   ;;  %v368_v11 = vshrl.u32 %v367_v10, 7  ;;  %v365_v14 = vld [vmem:[%s1587_s3] sm:$0x7] }
  0x68   : > { %432 = vmatprep.subr.bf16.mxu1 %v1073_v3  ;;  %v356_v6 = vpack.c.bf16 %v355_v5, %v355_v5  ;;  %v1076_v7 = vld [vmem:[#allocation8 + $0x20] ss:$12 sps:$4 sm:$0xff]   ;;  %955 = vmatprep.subr.bf16.mxu0 %v1301_v8  ;;  %v1077_v9 = vld [vmem:[#allocation8 + $0x8] ss:$12 sps:$4 sm:$0xff]   ;;  %vm579_vm2 = vcmask 1043456   ;;  %vm565_vm3 = vcmask 64512  }
  0x69   : > { %971 = vmatprep.mubr.msk.bf16.mxu0 %vm1302_vm1, %v1301_v8  ;;  %v369_v12 = vsub.s32 0, %v368_v11  ;;  %v373_v13 = vsub.s32 1, %v368_v11  ;;  %v377_v26 = vsub.s32 2, %v368_v11  ;;  %v523_v36 = vld [vmem:[%s1487_s16] sm:$0xf]  ;;  %v1078_v50 = vld [vmem:[#allocation9 + $0x38] sm:$0xff]  }
  0x6a   : > { %v524_v37 = vunpack.c.l.bf16 %v523_v36  ;;  %956 = vmatpush3.bf16.msra.mxu0 %v1078_v50  ;;  %v1079_v51 = vld [vmem:[#allocation9 + $0x30] sm:$0xff]   ;;  %v1080_v52 = vld [vmem:[#allocation9 + $0x28] sm:$0xff]   ;;  %v1081_v53 = vld [vmem:[#allocation9 + $0x20] sm:$0xff]   ;;  %s914_s13 = sshll.u32 %s1282_s24, 7  ;;  %s349_s18 = scalar_lea.vmem [#allocation11], %s888_s2 }
  0x6b   : > { %433 = vmatpush1.bf16.msra.mxu1 %v1075_v4  ;;  %v370_v15 = vrot.slane %v365_v14, %v369_v12  ;;  %v374_v16 = vrot.slane %v365_v14, %v373_v13  ;;  %v378_v27 = vrot.slane %v365_v14, %v377_v26  ;;  %957 = vmatprep.subr.bf16.mxu0 %v1301_v8  ;;  %v1082_v54 = vld [vmem:[#allocation9 + $0x18] sm:$0xff]   ;;  %v1083_v55 = vld [vmem:[#allocation9 + $0x10] sm:$0xff]   ;;  %v1084_v56 = vld [vmem:[#allocation9 + $0x8] sm:$0xff]   ;;  %s753_s20 = sshll.u32 %s349_s18, 4  ;;  %s1536_s11 = scalar_lea.hbm %s1590_s6, %s914_s13  ;;  %s1538_s20 = int_to_ptr.vmem [resolvable:$true] %s753_s20 }
  0x6c   : > { %935 = vmatprep.subr.bf16.mxu1 %v1301_v8  ;;  %v1085_v57 = vld [vmem:[#allocation9] sm:$0xff]   ;;  %v904_v2 = vld [vmem:[%s1589_s5] ss:$0 sm:$0xff]  ;;  %s739_s17 = scalar_lea.sflag [#allocation5], %s1475_s0  ;;  %s1198_s24 = scalar_lea.vmem %s1538_s20, 128 }
  0x6d   : > { %p1199_p4 = scmp.ne.s32.totalorder %s1538_s20, %s1198_s24  ;;  %s1303_s19 = smov [#allocation11]  }
  0x6e   : > { %899 = vmatmul.mubr.msk.bf16.vlgmr.msra.gmra.mxu1 %vm414_vm0, %v356_v6  ;;  %958 = vmatpush3.bf16.msra.mxu0 %v1079_v51  ;;  %s1202_s2 = sshll.u32 %s1303_s19, 4  ;;  %s1203_s2 = int_to_ptr.vmem [resolvable:$false] %s1202_s2 }
  0x6f   : > { %936 = vmatpush3.bf16.msra.mxu1 %v1076_v7  ;;  %939 = vmatprep.mubr.msk.bf16.mxu1 %vm1302_vm1, %v1301_v8  ;;  %p1200_p3 = pnand %p1199_p4, %p1430_p9  ;;  %s1204_s4 = scalar_lea.vmem %s1203_s2, 256 }
  0x70   : > { %937 = vmatprep.subr.bf16.mxu1 %v1301_v8  ;;  %959 = vmatprep.subr.bf16.mxu0 %v1301_v8  ;;  %p1205_p11 = scmp.lt.s32.totalorder %s1538_s20, %s1203_s2  ;;  %p1206_p5 = scmp.lt.s32.totalorder %s1204_s4, %s1198_s24 }
  0x71   : > { %p1201_p7 = pneg %p1200_p3 }
  0x72   : > { %960 = vmatpush3.bf16.msra.mxu0 %v1080_v52  ;;  %p1207_p10 = por %p1206_p5, %p1205_p11 }
  0x73   : > { %938 = vmatpush3.bf16.msra.mxu1 %v1077_v9  ;;  %961 = vmatprep.subr.bf16.mxu0 %v1301_v8 }
  0x74   : > { %943 = vmatprep.subr.bf16.mxu1 %v1301_v8  ;;  %p1208_p1 = pnand %p1207_p10, %p1201_p7 }
  0x76   : > { %940 = vmatmul.mubr.msk.bf16.vlgmr.msra.gmra.mxu1 %vm414_vm0, %v356_v6  ;;  %962 = vmatpush3.bf16.msra.mxu0 %v1081_v53 }
  0x77   : > { %945 = vmatprep.mubr.msk.bf16.mxu1 %vm1302_vm1, %v1301_v8  ;;  %963 = vmatprep.subr.bf16.mxu0 %v1301_v8 }
  0x7a   : > { %964 = vmatpush3.bf16.msra.mxu0 %v1082_v54 }
  0x7b   : > { %965 = vmatprep.subr.bf16.mxu0 %v1301_v8 }
  0x7e   : > { %966 = vmatpush3.bf16.msra.mxu0 %v1083_v55 }
  0x7f   : > { %967 = vmatprep.subr.bf16.mxu0 %v1301_v8 }
  0x82   : > { %968 = vmatpush3.bf16.msra.mxu0 %v1084_v56 }
  0x83   : > { %969 = vmatprep.subr.bf16.mxu0 %v1301_v8 }
  0x86   : > { %970 = vmatpush3.bf16.msra.mxu0 %v1085_v57 }
 0x12e   : > { %v452_v17 = vpop.f32.mrf.mxu1 }
 0x12f   : > { %v453_v19 = vadd.f32 %v452_v17, %v370_v15 }
 0x130   : > { %v454_v18 = vpop.f32.mrf.mxu1 }
 0x131   : > { %v455_v20 = vadd.f32 %v454_v18, %v374_v16 }
 0x132   : > { %v456_v21 = vpop.f32.mrf.mxu1 }
 0x133   : > { %v917_v22 = vpack.c.bf16 %v455_v20, %v453_v19 }
 0x134   : > { %v457_v23 = vpop.f32.mrf.mxu1 }
 0x135   : > { %512 = vst [vmem:[#allocation2] sm:$0xff] %v917_v22 }
 0x136   : > { %v493_v28 = vpop.f32.mrf.mxu1 }
 0x137   : > { %v494_v29 = vadd.f32 %v493_v28, %v378_v27 }
 0x138   : > { %v941_v30 = vpop.f32.mrf.mxu1 }
 0x139   : > { %v918_v31 = vpack.c.bf16 %v494_v29, %v494_v29 }
 0x13a   : > { %v496_v32 = vpop.f32.mrf.mxu1 }
 0x13b   : > { %513 = vst [vmem:[#allocation2 + $0x8] sm:$0xf] %v918_v31 }
 0x13c   : > { %v521_v24 = vld [vmem:[#allocation2 + $0x4] sm:$0xf]  ;;  %v520_v25 = vld [vmem:[#allocation2] sm:$0xf]  ;;  %v942_v33 = vpop.f32.mrf.mxu1 }
 0x13d   : > { %944 = vmatpush3.bf16.xpose.msra.mxu1 %v521_v24 }
 0x13e   : > { %949 = vmatprep.subr.bf16.mxu1 %v1301_v8 }
 0x142   : > { %v522_v34 = vld [vmem:[#allocation2 + $0x8] sm:$0xf] }
 0x143   : > { %v581_v35 = vsel %vm579_vm2, %v522_v34, 0 }
 0x144   : > { %946 = vmatmul.mubr.bf16.vlgmr.msra.gmra.mxu1 %v520_v25 }
 0x145   : > { %951 = vmatprep.mubr.msk.bf16.mxu1 %vm1302_vm1, %v1301_v8  ;;  %950 = vmatpush3.bf16.msra.mxu1 %v581_v35 }
 0x204   : > { %v559_v38 = vpop.f32.mrf.mxu1 }
 0x205   : > { %v560_v39 = vadd.f32 %v559_v38, %v524_v37 }
 0x206   : > { %v947_v40 = vpop.f32.mrf.mxu1 }
 0x207   : > { %v566_v41 = vsel %vm565_vm3, %v560_v39, -inf }
 0x208   : > { %567 = vmax.xlane.f32.xlu0 %v566_v41  ;;  %v562_v42 = vpop.f32.mrf.mxu1 }
 0x20a   : > { %v948_v43 = vpop.f32.mrf.mxu1 }
 0x291   : > { %v568_v44 = vpop.xlane.xlu0 %567 }
 0x292   : > { %v569_v45 = vsub.f32 %v560_v39, %v568_v44 }
 0x294   : > { %v570_v46 = vmul.f32 1.442695, %v569_v45 }
 0x296   : > { %1086 = vpow2.f32 %v570_v46 }
 0x2a3   : > { %v1087_v47 = vpop.eup %1086 }
 0x2a4   : > { %v572_v48 = vsel %vm565_vm3, %v1087_v47, 0.0  ;;  %v575_v49 = vpack.c.bf16 %v1087_v47, %v1087_v47 }
 0x2a5   : > { %573 = vadd.xlane.f32.xlu0 %v572_v48 }
 0x2a6   : > { %952 = vmatmul.mubr.msk.bf16.vlgmr.msra.gmra.mxu1 %vm565_vm3, %v575_v49 }
 0x32e   : > { %v574_v58 = vpop.xlane.xlu0 %573 }
 0x32f   : > { %1088 = vrcp.f32 %v574_v58 }
 0x33c   : > { %v1089_v59 = vpop.eup %1088 }
 0x366   : > { %v617_v60 = vpop.f32.mrf.mxu1 }
 0x367   : > { %v624_v61 = vmul.f32 %v1089_v59, %v617_v60 }
 0x368   : > { %v953_v62 = vpop.f32.mrf.mxu1 }
 0x369   : > { %v625_v63 = vpack.c.bf16 %v624_v61, %v624_v61 }
 0x36a   : > { %v620_v0 = vpop.f32.mrf.mxu1 }
 0x36b   : > { %972 = vmatmul.mubr.bf16.vlgmr.msra.gmra.mxu0 %v625_v63 }
 0x36c   : > { %v954_v1 = vpop.f32.mrf.mxu1 }
 0x42b   : > { %v731_v3 = vpop.f32.mrf.mxu0 }
 0x42c   : > { %v732_v4 = vadd.f32 %v904_v2, %v731_v3 }
 0x42d   : > { %v973_v5 = vpop.f32.mrf.mxu0 }
 0x42e   : > { %737 = vst [vmem:[%s349_s18] sm:$0xff] %v732_v4 }
 0x42f   : > { %v734_v6 = vpop.f32.mrf.mxu0 }
 0x430   : > { %1211 = shalt.err (!%p1208_p1)
}
 0x431   : > { %s1212_s23 = scalar_lea.hbm %s1536_s11, 128  ;;  %s1216_s9 = scalar_lea.hbm %s1590_s6, 256 }
 0x432   : > { %p1213_p2 = scmp.ne.s32.totalorder %s1536_s11, %s1212_s23  ;;  %p1217_p13 = scmp.lt.s32.totalorder %s1536_s11, %s1590_s6 }
 0x433   : > { %p1218_p0 = scmp.lt.s32.totalorder %s1216_s9, %s1212_s23 }
 0x434   : > { %p1214_p6 = pnand %p1213_p2, %p1430_p9 }
 0x435   : > { %p1219_p12 = por %p1218_p0, %p1217_p13 }
 0x436   : > { %p1215_p8 = pneg %p1214_p6 }
 0x438   : > { %p1220_p4 = pnand %p1219_p12, %p1215_p8 }
 0x43a   : > { %1223 = shalt.err (!%p1220_p4)
}
 0x43b   : > { %987 = dma.vmem_to_hbm [thread:$0]  (%p1430_p9), %s1538_s20, 128, %s1536_s11, %s739_s17   ;;  %v974_v7 = vpop.f32.mrf.mxu0 }
 0x43c PF: > { %s765_s27 = sand.u32 1, %s1270_s21   ;;  %p1614_p3 = scmp.ne.s32.totalorder %s1599_s30, 0 }
 0x43d   : > { %p1615_p7 = scmp.ge.s32.totalorder %s1290_s26, 2  ;;  %s766_s29 = scalar_lea.sflag [#allocation5], %s765_s27 }
 0x43f   : > { %p1004_p11 = pnand %p1615_p7, %p1614_p3 }
 0x441   : > { %p1005_p5 = pneg %p1004_p11 }
 0x443   : > { %1265 = dma.done.wait (%p1005_p5), %s766_s29, 128  }
 0x444   : > { %1267 = vsyncadd (%p1005_p5), %s766_s29, 4294967168  ;;  %s26_s26 = sadd.s32 1, %s1290_s26   ;;  %s1616_s10 = sld [smem:[#allocation17_spill]] }
 0x445   : > { %p23_p10 = scmp.ge.s32.totalorder %s26_s26, 4   ;;  %s1617_s23 = sld [smem:[#allocation19_spill]] }
 0x446   : > { %s1618_s28 = sld [smem:[#allocation18_spill]]  ;;  %s1619_s21 = smov %s1274_s22 }
 0x447   : > { %s1621_s24 = smov %s1286_s25 }
 0x448   :  { %25 = sbr.rel (!%p23_p10) target bundleno = 13 (0xd), region = 115 }
 0x44a   : > { %s1620_s22 = smov %s1616_s10 }
 0x44c   : > { %s1622_s25 = smov %s1618_s28 }
 0x44d   :  { %771 = vsyncpa [#allocation4], 1 }
 0x44e   :  { %773 = vsyncpa [#allocation4 + $0x1], 1 }
 0x44f   :  { %774 = vsyncpa [#allocation7], 1 }
 0x450   :  { %776 = vsyncpa [#allocation7 + $0x1], 1 }
 0x451   :  { %777 = vsyncpa [#allocation10], 1 }
 0x452   :  { %778 = vsyncpa [#allocation5], 1 }
 0x453   :  { %780 = vsyncpa [#allocation5 + $0x1], 1 }

// kernel: tpu_custom_call.1
= control target key start
LH: loop header
LB: loop body
LE: loop exit
PB: predicated region body
PF: predicated region fallthrough
CT: control target
= control target key end

     0   :  { %s1584_s0 = inlined_call_operand.hbm [shape: f32[2,8,32], index: 0, kind: input, shape index: {}]   ;;  %s1585_s1 = inlined_call_operand.hbm [shape: bf16[2,8,8], index: 1, kind: input, shape index: {}]   ;;  %s1586_s2 = inlined_call_operand.hbm [shape: bf16[32,384], index: 2, kind: input, shape index: {}]   ;;  %s1587_s3 = inlined_call_operand.vmem [shape: f32[1,384], index: 3, kind: input, shape index: {}]   ;;  %s1588_s4 = inlined_call_operand.hbm [shape: bf16[128,128], index: 4, kind: input, shape index: {}]   ;;  %s1589_s5 = inlined_call_operand.vmem [shape: f32[1,128], index: 5, kind: input, shape index: {}]   ;;  %s1590_s6 = inlined_call_operand.hbm [shape: f32[2,8,128], index: 6, kind: output, shape index: {}]  }
   0x1   :  { %1594 = sst [smem:[#allocation20_spill]] %s1584_s0 }
   0x2   :  { %1595 = sst [smem:[#allocation21_spill]] %s1586_s2 }
   0x3   :  { %1596 = sst [smem:[#allocation22_spill]] %s1588_s4 }
   0x4   :  { %11 = vsyncpa [#allocation4], 0 }
   0x5   :  { %13 = vsyncpa [#allocation4 + $0x1], 0 }
   0x6   :  { %14 = vsyncpa [#allocation7], 0 }
   0x7   :  { %16 = vsyncpa [#allocation7 + $0x1], 0 }
   0x8   :  { %17 = vsyncpa [#allocation10], 0 }
   0x9   :  { %18 = vsyncpa [#allocation5], 0 }
   0xa   :  { %20 = vsyncpa [#allocation5 + $0x1], 0  ;;  %s1339_s21 = smov 0   ;;  %s1341_s22 = smov 0  }
   0xb   :  { %s1343_s23 = smov 0   ;;  %s1345_s24 = smov 0  }
   0xc   :  { %s1347_s25 = smov 0   ;;  %s1349_s26 = smov 0  }
   0xd LB: > { %1597 = sst [smem:[#allocation17_spill]] %s1278_s23  ;;  %s1370_s27 = sadd.s32 4294967295, %s1290_s26   ;;  %s1290_s26 = sphi %s1349_s26, %s26_s26   ;;  %s1286_s25 = sphi %s1347_s25, %s1622_s25   ;;  %s1282_s24 = sphi %s1345_s24, %s1621_s24   ;;  %s1278_s23 = sphi %s1343_s23, %s1617_s23   ;;  %s1274_s22 = sphi %s1341_s22, %s1620_s22   ;;  %s1270_s21 = sphi %s1339_s21, %s1619_s21  }
   0xe   : > { %s878_s28 = sadd.s32 4294967294, %s1290_s26   ;;  %p58_p0 = scmp.ne.s32.totalorder %s1274_s22, %s1270_s21 }
   0xf   : > { %p1591_p1 = scmp.eq.s32.totalorder %s1370_s27, 0  ;;  %p202_p3 = scmp.eq.s32.totalorder %s878_s28, 1 }
  0x10   : > { %p879_p5 = scmp.ge.s32.totalorder %s1290_s26, 1  ;;  %p209_p7 = scmp.lt.s32.totalorder %s1290_s26, 3 }
  0x11   : > { %p1379_p4 = por %p1591_p1, %p58_p0  ;;  %p1384_p6 = por %p202_p3, %p58_p0 }
  0x12   : > { %p1389_p8 = pnand %p879_p5, %p209_p7  ;;  %s1292_s8 = smov [#allocation8]  }
  0x13   : > { %s1599_s30 = scalar_select %p1384_p6, 1, 0 }
  0x14   : > { %s221_s9 = sshll.u32 %s1292_s8, 4  ;;  %p989_p9 = pneg %p1389_p8  ;;  %s222_s9 = int_to_ptr.vmem [resolvable:$true] %s221_s9 }
  0x15   : > { %s1293_s11 = smov [#allocation9]   ;;  %s1101_s13 = scalar_lea.vmem %s222_s9, 768 }
  0x16   : > { %p1398_p11 = pnand %p989_p9, %p1591_p1  ;;  %s237_s12 = sshll.u32 %s1293_s11, 4  ;;  %s238_s12 = int_to_ptr.vmem [resolvable:$true] %s237_s12 }
  0x17   : > { %p1102_p13 = scmp.ne.s32.totalorder %s222_s9, %s1101_s13  ;;  %p1109_p5 = scmp.lt.s32.totalorder %s222_s9, %s222_s9 }
  0x18   : > { %p1092_p12 = pneg %p1398_p11  ;;  %p1110_p7 = scmp.lt.s32.totalorder %s1101_s13, %s1101_s13 }
  0x1a   : > { %p1104_p0 = pnand %p1102_p13, %p1092_p12  ;;  %p1111_p10 = por %p1110_p7, %p1109_p5 }
  0x1c   : > { %p1105_p3 = pneg %p1104_p0 }
  0x1e   : > { %p1112_p9 = pnand %p1111_p10, %p1105_p3 }
  0x20   : > { %1115 = shalt.err (!%p1112_p9)
}
  0x21   : > { %s1294_s14 = smov 192   ;;  %s1295_s15 = smov 12  }
  0x22   : > { %s1602_s2 = sld [smem:[#allocation21_spill]]  ;;  %s1127_s18 = scalar_lea.vmem %s238_s12, 1024 }
  0x23   : > { %p1128_p1 = scmp.ne.s32.totalorder %s238_s12, %s1127_s18  ;;  %p1135_p2 = scmp.lt.s32.totalorder %s238_s12, %s238_s12 }
  0x24   : > { %p1136_p6 = scmp.lt.s32.totalorder %s1127_s18, %s1127_s18 }
  0x25   : > { %p1130_p13 = pnand %p1128_p1, %p1092_p12 }
  0x26   : > { %p1137_p5 = por %p1136_p6, %p1135_p2 }
  0x27   : > { %p1131_p0 = pneg %p1130_p13 }
  0x28   : > { %992 = dma.hbm_to_vmem [thread:$0]  (!%p1398_p11), %s1602_s2, 768, %s222_s9, [#allocation7], %s1294_s14, %s1294_s14, %s1295_s15  }
  0x29   : > { %p1138_p10 = pnand %p1137_p5, %p1131_p0 }
  0x2b   : > { %1141 = shalt.err (!%p1138_p10)
}
  0x2c   : > { %s1296_s19 = smov 64   ;;  %s1297_s20 = smov 4  }
  0x2d   : > { %s1603_s4 = sld [smem:[#allocation22_spill]]  ;;  %s38_s9 = sadd.s32 1, %s1286_s25 }
  0x2e   : > { %s45_s11 = sadd.s32 1, %s1278_s23  ;;  %p40_p1 = scmp.ge.s32.totalorder %s38_s9, 2 }
  0x2f   : > { %p52_p2 = scmp.ne.s32.totalorder %s1278_s23, %s1274_s22  ;;  %p53_p6 = scmp.eq.s32.totalorder %s1290_s26, 0 }
  0x30   : > { %p1009_p12 = scmp.lt.s32.totalorder %s1290_s26, 2  ;;  %s1624_s9 = smov (%p40_p1, %s38_s9), 0 }
  0x31   : > { %1604 = sst [smem:[#allocation18_spill]] %s1624_s9  ;;  %p54_p3 = por %p53_p6, %p52_p2 }
  0x32   : > { %p1605_p7 = scmp.eq.s32.totalorder %s1370_s27, 1  ;;  %s42_s13 = ssub.s32 %s1286_s25, %s1624_s9 }
  0x33   : > { %995 = dma.hbm_to_vmem [thread:$0]  (!%p1398_p11), %s1603_s4, 1024, %s238_s12, [#allocation10], %s1296_s19, %s1296_s19, %s1297_s20  }
  0x34   : > { %p1430_p9 = por %p1605_p7, %p52_p2  ;;  %s1437_s14 = sand.u32 1, %s1278_s23  }
  0x35   : > { %p43_p11 = scmp.eq.s32.totalorder %s42_s13, 0  ;;  %s883_s12 = sshll.u32 %s1437_s14, 3 }
  0x36   : > { %s884_s15 = sshll.u32 %s1286_s25, 7  ;;  %s1608_s0 = sld [smem:[#allocation20_spill]] }
  0x37   : > { %s1442_s16 = scalar_select %p43_p11, %s1278_s23, %s45_s11  }
  0x38   : > { %s258_s20 = scalar_lea.vmem [#allocation3], %s883_s12  ;;  %p1449_p13 = pnand %p1009_p12, %p54_p3 }
  0x39   : > { %1607 = sst [smem:[#allocation19_spill]] %s1442_s16  ;;  %s265_s28 = sshll.u32 %s258_s20, 4  ;;  %s266_s28 = int_to_ptr.vmem [resolvable:$true] %s265_s28 }
  0x3a   : > { %s272_s2 = sand.u32 1, %s1290_s26   ;;  %s255_s13 = scalar_lea.sflag [#allocation4], %s1437_s14 }
  0x3b   : > { %p1144_p0 = pneg %p1449_p13  ;;  %s1155_s11 = scalar_lea.vmem %s266_s28, 128 }
  0x3c   : > { %s263_s19 = scalar_lea.hbm %s1608_s0, %s884_s15  ;;  %p1156_p5 = scmp.ne.s32.totalorder %s266_s28, %s1155_s11 }
  0x3d   : > { %s1298_s12 = smov [#allocation3]  }
  0x3e   : > { %p1158_p10 = pnand %p1156_p5, %p1144_p0  ;;  %s1160_s15 = sshll.u32 %s1298_s12, 4  ;;  %s1161_s15 = int_to_ptr.vmem [resolvable:$false] %s1160_s15 }
  0x3f   : > { %s1162_s17 = scalar_lea.vmem %s1161_s15, 256  ;;  %p1163_p2 = scmp.lt.s32.totalorder %s266_s28, %s1161_s15 }
  0x40   : > { %p1159_p1 = pneg %p1158_p10  ;;  %p1164_p6 = scmp.lt.s32.totalorder %s1162_s17, %s1155_s11 }
  0x42   : > { %p1165_p12 = por %p1164_p6, %p1163_p2 }
  0x44   : > { %p1166_p3 = pnand %p1165_p12, %p1159_p1 }
  0x46   : > { %1169 = shalt.err (!%p1166_p3)
}
  0x47   : > { %999 = dma.hbm_to_vmem [thread:$0]  (!%p1449_p13), %s263_s19, 128, %s266_s28, %s255_s13  }
  0x48   : > { %s885_s18 = sshll.u32 %s1437_s14, 2  ;;  %s886_s20 = sshll.u32 %s1286_s25, 6 }
  0x49   : > { %s282_s9 = scalar_lea.hbm %s1585_s1, %s886_s20  ;;  %s276_s12 = scalar_lea.vmem [#allocation6], %s885_s18 }
  0x4a   : > { %s284_s16 = sshll.u32 %s276_s12, 4  ;;  %s273_s15 = scalar_lea.sflag [#allocation7], %s272_s2  ;;  %s285_s16 = int_to_ptr.vmem [resolvable:$true] %s284_s16 }
  0x4b   : > { %s1183_s11 = scalar_lea.vmem %s285_s16, 64  ;;  %s1299_s17 = smov [#allocation6]  }
  0x4c   : > { %p1184_p7 = scmp.ne.s32.totalorder %s285_s16, %s1183_s11  ;;  %s1188_s23 = sshll.u32 %s1299_s17, 4  ;;  %s1189_s23 = int_to_ptr.vmem [resolvable:$false] %s1188_s23 }
  0x4d   : > { %s1190_s19 = scalar_lea.vmem %s1189_s23, 128  ;;  %p1191_p10 = scmp.lt.s32.totalorder %s285_s16, %s1189_s23 }
  0x4e   : > { %p1186_p11 = pnand %p1184_p7, %p1144_p0  ;;  %p1192_p1 = scmp.lt.s32.totalorder %s1190_s19, %s1183_s11 }
  0x50   : > { %p1187_p5 = pneg %p1186_p11  ;;  %p1193_p2 = por %p1192_p1, %p1191_p10 }
  0x52   : > { %p1194_p6 = pnand %p1193_p2, %p1187_p5 }
  0x54   : > { %1197 = shalt.err (!%p1194_p6)
}
  0x55   : > { %1002 = dma.hbm_to_vmem [thread:$0]  (!%p1449_p13), %s282_s9, 64, %s285_s16, %s273_s15  }
  0x56   : > { %293 = sbr.rel (%p1389_p8) target bundleno = 1084 (0x43c), region = 44  ;;  %s1475_s0 = sand.u32 (!%p1389_p8), 1, %s1274_s22  }
  0x57   : > { %s888_s2 = sshll.u32 (!%p1389_p8), %s1475_s0, 3  ;;  %s296_s4 = scalar_lea.sflag (!%p1389_p8), [#allocation4], %s1475_s0 }
  0x58   : > { %s299_s23 = scalar_lea.vmem (!%p1389_p8), [#allocation3], %s888_s2 }
  0x5b   : > { %1249 = dma.done.wait (%p1379_p4), %s296_s4, 128  }
  0x5c   : > { %1251 = vsyncadd (%p1379_p4), %s296_s4, 4294967168  ;;  %s304_s7 = sand.u32 1, %s1370_s27   ;;  %s889_s9 = sshll.u32 %s1475_s0, 2 }
  0x5d   : > { %s305_s14 = scalar_lea.sflag [#allocation7], %s304_s7  ;;  %s1487_s16 = scalar_lea.vmem [#allocation6], %s889_s9 }
  0x5e   : > { %1253 = dma.done.wait (%p1379_p4), %s305_s14, 64  }
  0x5f   : > { %1255 = vsyncadd (%p1379_p4), %s305_s14, 4294967232  ;;  %p1610_p8 = scmp.eq.s32.totalorder %s1370_s27, 0 }
  0x61   : > { %1257 = dma.done.wait (%p1610_p8), [#allocation7], 768   ;;  %p1611_p13 = pmov %p1610_p8 }
  0x62   : > { %p1612_p0 = pmov %p1610_p8 }
  0x63   : > { %1259 = vsyncadd (%p1611_p13), [#allocation7], 4294966528 }
  0x64   : > { %1261 = dma.done.wait (%p1612_p0), [#allocation10], 1024   ;;  %p1613_p12 = pmov %p1612_p0 }
  0x65   : > { %v1300_v0 = vmov 0   ;;  %v1070_v1 = vld [vmem:[#allocation8 + $0x1c] ss:$12 sps:$4 sm:$0xff]   ;;  %v1072_v2 = vld [vmem:[#allocation8 + $0x18] ss:$12 sps:$4 sm:$0xff]   ;;  %vm414_vm0 = vcmask 261120   ;;  %v367_v10 = vlaneseq }
  0x66   : > { %1263 = vsyncadd (%p1613_p12), [#allocation10], 4294966272  ;;  %450 = vmatprep.mubr.bf16.mxu1 %v1300_v0  ;;  %430 = vmatprep.subr.bf16.mxu1 %v1070_v1  ;;  %v1073_v3 = vld [vmem:[#allocation8 + $0x4] ss:$12 sps:$4 sm:$0xff]   ;;  %v1075_v4 = vld [vmem:[#allocation8] ss:$12 sps:$4 sm:$0xff]  }
  0x67   : > { %431 = vmatpush1.bf16.msra.mxu1 %v1072_v2  ;;  %v355_v5 = vld [vmem:[%s299_s23] sm:$0xff]  ;;  %v1301_v8 = vmov 0.0   ;;  %vm1302_vm1 = vmmov 0   ;;  %v368_v11 = vshrl.u32 %v367_v10, 7  ;;  %v365_v14 = vld [vmem:[%s1587_s3] sm:$0x7] }
  0x68   : > { %432 = vmatprep.subr.bf16.mxu1 %v1073_v3  ;;  %v356_v6 = vpack.c.bf16 %v355_v5, %v355_v5  ;;  %v1076_v7 = vld [vmem:[#allocation8 + $0x20] ss:$12 sps:$4 sm:$0xff]   ;;  %955 = vmatprep.subr.bf16.mxu0 %v1301_v8  ;;  %v1077_v9 = vld [vmem:[#allocation8 + $0x8] ss:$12 sps:$4 sm:$0xff]   ;;  %vm579_vm2 = vcmask 1043456   ;;  %vm565_vm3 = vcmask 64512  }
  0x69   : > { %971 = vmatprep.mubr.msk.bf16.mxu0 %vm1302_vm1, %v1301_v8  ;;  %v369_v12 = vsub.s32 0, %v368_v11  ;;  %v373_v13 = vsub.s32 1, %v368_v11  ;;  %v377_v26 = vsub.s32 2, %v368_v11  ;;  %v523_v36 = vld [vmem:[%s1487_s16] sm:$0xf]  ;;  %v1078_v50 = vld [vmem:[#allocation9 + $0x38] sm:$0xff]  }
  0x6a   : > { %v524_v37 = vunpack.c.l.bf16 %v523_v36  ;;  %956 = vmatpush3.bf16.msra.mxu0 %v1078_v50  ;;  %v1079_v51 = vld [vmem:[#allocation9 + $0x30] sm:$0xff]   ;;  %v1080_v52 = vld [vmem:[#allocation9 + $0x28] sm:$0xff]   ;;  %v1081_v53 = vld [vmem:[#allocation9 + $0x20] sm:$0xff]   ;;  %s914_s13 = sshll.u32 %s1282_s24, 7  ;;  %s349_s18 = scalar_lea.vmem [#allocation11], %s888_s2 }
  0x6b   : > { %433 = vmatpush1.bf16.msra.mxu1 %v1075_v4  ;;  %v370_v15 = vrot.slane %v365_v14, %v369_v12  ;;  %v374_v16 = vrot.slane %v365_v14, %v373_v13  ;;  %v378_v27 = vrot.slane %v365_v14, %v377_v26  ;;  %957 = vmatprep.subr.bf16.mxu0 %v1301_v8  ;;  %v1082_v54 = vld [vmem:[#allocation9 + $0x18] sm:$0xff]   ;;  %v1083_v55 = vld [vmem:[#allocation9 + $0x10] sm:$0xff]   ;;  %v1084_v56 = vld [vmem:[#allocation9 + $0x8] sm:$0xff]   ;;  %s753_s20 = sshll.u32 %s349_s18, 4  ;;  %s1536_s11 = scalar_lea.hbm %s1590_s6, %s914_s13  ;;  %s1538_s20 = int_to_ptr.vmem [resolvable:$true] %s753_s20 }
  0x6c   : > { %935 = vmatprep.subr.bf16.mxu1 %v1301_v8  ;;  %v1085_v57 = vld [vmem:[#allocation9] sm:$0xff]   ;;  %v904_v2 = vld [vmem:[%s1589_s5] ss:$0 sm:$0xff]  ;;  %s739_s17 = scalar_lea.sflag [#allocation5], %s1475_s0  ;;  %s1198_s24 = scalar_lea.vmem %s1538_s20, 128 }
  0x6d   : > { %p1199_p4 = scmp.ne.s32.totalorder %s1538_s20, %s1198_s24  ;;  %s1303_s19 = smov [#allocation11]  }
  0x6e   : > { %899 = vmatmul.mubr.msk.bf16.vlgmr.msra.gmra.mxu1 %vm414_vm0, %v356_v6  ;;  %958 = vmatpush3.bf16.msra.mxu0 %v1079_v51  ;;  %s1202_s2 = sshll.u32 %s1303_s19, 4  ;;  %s1203_s2 = int_to_ptr.vmem [resolvable:$false] %s1202_s2 }
  0x6f   : > { %936 = vmatpush3.bf16.msra.mxu1 %v1076_v7  ;;  %939 = vmatprep.mubr.msk.bf16.mxu1 %vm1302_vm1, %v1301_v8  ;;  %p1200_p3 = pnand %p1199_p4, %p1430_p9  ;;  %s1204_s4 = scalar_lea.vmem %s1203_s2, 256 }
  0x70   : > { %937 = vmatprep.subr.bf16.mxu1 %v1301_v8  ;;  %959 = vmatprep.subr.bf16.mxu0 %v1301_v8  ;;  %p1205_p11 = scmp.lt.s32.totalorder %s1538_s20, %s1203_s2  ;;  %p1206_p5 = scmp.lt.s32.totalorder %s1204_s4, %s1198_s24 }
  0x71   : > { %p1201_p7 = pneg %p1200_p3 }
  0x72   : > { %960 = vmatpush3.bf16.msra.mxu0 %v1080_v52  ;;  %p1207_p10 = por %p1206_p5, %p1205_p11 }
  0x73   : > { %938 = vmatpush3.bf16.msra.mxu1 %v1077_v9  ;;  %961 = vmatprep.subr.bf16.mxu0 %v1301_v8 }
  0x74   : > { %943 = vmatprep.subr.bf16.mxu1 %v1301_v8  ;;  %p1208_p1 = pnand %p1207_p10, %p1201_p7 }
  0x76   : > { %940 = vmatmul.mubr.msk.bf16.vlgmr.msra.gmra.mxu1 %vm414_vm0, %v356_v6  ;;  %962 = vmatpush3.bf16.msra.mxu0 %v1081_v53 }
  0x77   : > { %945 = vmatprep.mubr.msk.bf16.mxu1 %vm1302_vm1, %v1301_v8  ;;  %963 = vmatprep.subr.bf16.mxu0 %v1301_v8 }
  0x7a   : > { %964 = vmatpush3.bf16.msra.mxu0 %v1082_v54 }
  0x7b   : > { %965 = vmatprep.subr.bf16.mxu0 %v1301_v8 }
  0x7e   : > { %966 = vmatpush3.bf16.msra.mxu0 %v1083_v55 }
  0x7f   : > { %967 = vmatprep.subr.bf16.mxu0 %v1301_v8 }
  0x82   : > { %968 = vmatpush3.bf16.msra.mxu0 %v1084_v56 }
  0x83   : > { %969 = vmatprep.subr.bf16.mxu0 %v1301_v8 }
  0x86   : > { %970 = vmatpush3.bf16.msra.mxu0 %v1085_v57 }
 0x12e   : > { %v452_v17 = vpop.f32.mrf.mxu1 }
 0x12f   : > { %v453_v19 = vadd.f32 %v452_v17, %v370_v15 }
 0x130   : > { %v454_v18 = vpop.f32.mrf.mxu1 }
 0x131   : > { %v455_v20 = vadd.f32 %v454_v18, %v374_v16 }
 0x132   : > { %v456_v21 = vpop.f32.mrf.mxu1 }
 0x133   : > { %v917_v22 = vpack.c.bf16 %v455_v20, %v453_v19 }
 0x134   : > { %v457_v23 = vpop.f32.mrf.mxu1 }
 0x135   : > { %512 = vst [vmem:[#allocation2] sm:$0xff] %v917_v22 }
 0x136   : > { %v493_v28 = vpop.f32.mrf.mxu1 }
 0x137   : > { %v494_v29 = vadd.f32 %v493_v28, %v378_v27 }
 0x138   : > { %v941_v30 = vpop.f32.mrf.mxu1 }
 0x139   : > { %v918_v31 = vpack.c.bf16 %v494_v29, %v494_v29 }
 0x13a   : > { %v496_v32 = vpop.f32.mrf.mxu1 }
 0x13b   : > { %513 = vst [vmem:[#allocation2 + $0x8] sm:$0xf] %v918_v31 }
 0x13c   : > { %v521_v24 = vld [vmem:[#allocation2 + $0x4] sm:$0xf]  ;;  %v520_v25 = vld [vmem:[#allocation2] sm:$0xf]  ;;  %v942_v33 = vpop.f32.mrf.mxu1 }
 0x13d   : > { %944 = vmatpush3.bf16.xpose.msra.mxu1 %v521_v24 }
 0x13e   : > { %949 = vmatprep.subr.bf16.mxu1 %v1301_v8 }
 0x142   : > { %v522_v34 = vld [vmem:[#allocation2 + $0x8] sm:$0xf] }
 0x143   : > { %v581_v35 = vsel %vm579_vm2, %v522_v34, 0 }
 0x144   : > { %946 = vmatmul.mubr.bf16.vlgmr.msra.gmra.mxu1 %v520_v25 }
 0x145   : > { %951 = vmatprep.mubr.msk.bf16.mxu1 %vm1302_vm1, %v1301_v8  ;;  %950 = vmatpush3.bf16.msra.mxu1 %v581_v35 }
 0x204   : > { %v559_v38 = vpop.f32.mrf.mxu1 }
 0x205   : > { %v560_v39 = vadd.f32 %v559_v38, %v524_v37 }
 0x206   : > { %v947_v40 = vpop.f32.mrf.mxu1 }
 0x207   : > { %v566_v41 = vsel %vm565_vm3, %v560_v39, -inf }
 0x208   : > { %567 = vmax.xlane.f32.xlu0 %v566_v41  ;;  %v562_v42 = vpop.f32.mrf.mxu1 }
 0x20a   : > { %v948_v43 = vpop.f32.mrf.mxu1 }
 0x291   : > { %v568_v44 = vpop.xlane.xlu0 %567 }
 0x292   : > { %v569_v45 = vsub.f32 %v560_v39, %v568_v44 }
 0x294   : > { %v570_v46 = vmul.f32 1.442695, %v569_v45 }
 0x296   : > { %1086 = vpow2.f32 %v570_v46 }
 0x2a3   : > { %v1087_v47 = vpop.eup %1086 }
 0x2a4   : > { %v572_v48 = vsel %vm565_vm3, %v1087_v47, 0.0  ;;  %v575_v49 = vpack.c.bf16 %v1087_v47, %v1087_v47 }
 0x2a5   : > { %573 = vadd.xlane.f32.xlu0 %v572_v48 }
 0x2a6   : > { %952 = vmatmul.mubr.msk.bf16.vlgmr.msra.gmra.mxu1 %vm565_vm3, %v575_v49 }
 0x32e   : > { %v574_v58 = vpop.xlane.xlu0 %573 }
 0x32f   : > { %1088 = vrcp.f32 %v574_v58 }
 0x33c   : > { %v1089_v59 = vpop.eup %1088 }
 0x366   : > { %v617_v60 = vpop.f32.mrf.mxu1 }
 0x367   : > { %v624_v61 = vmul.f32 %v1089_v59, %v617_v60 }
 0x368   : > { %v953_v62 = vpop.f32.mrf.mxu1 }
 0x369   : > { %v625_v63 = vpack.c.bf16 %v624_v61, %v624_v61 }
 0x36a   : > { %v620_v0 = vpop.f32.mrf.mxu1 }
 0x36b   : > { %972 = vmatmul.mubr.bf16.vlgmr.msra.gmra.mxu0 %v625_v63 }
 0x36c   : > { %v954_v1 = vpop.f32.mrf.mxu1 }
 0x42b   : > { %v731_v3 = vpop.f32.mrf.mxu0 }
 0x42c   : > { %v732_v4 = vadd.f32 %v904_v2, %v731_v3 }
 0x42d   : > { %v973_v5 = vpop.f32.mrf.mxu0 }
 0x42e   : > { %737 = vst [vmem:[%s349_s18] sm:$0xff] %v732_v4 }
 0x42f   : > { %v734_v6 = vpop.f32.mrf.mxu0 }
 0x430   : > { %1211 = shalt.err (!%p1208_p1)
}
 0x431   : > { %s1212_s23 = scalar_lea.hbm %s1536_s11, 128  ;;  %s1216_s9 = scalar_lea.hbm %s1590_s6, 256 }
 0x432   : > { %p1213_p2 = scmp.ne.s32.totalorder %s1536_s11, %s1212_s23  ;;  %p1217_p13 = scmp.lt.s32.totalorder %s1536_s11, %s1590_s6 }
 0x433   : > { %p1218_p0 = scmp.lt.s32.totalorder %s1216_s9, %s1212_s23 }
 0x434   : > { %p1214_p6 = pnand %p1213_p2, %p1430_p9 }
 0x435   : > { %p1219_p12 = por %p1218_p0, %p1217_p13 }
 0x436   : > { %p1215_p8 = pneg %p1214_p6 }
 0x438   : > { %p1220_p4 = pnand %p1219_p12, %p1215_p8 }
 0x43a   : > { %1223 = shalt.err (!%p1220_p4)
}
 0x43b   : > { %987 = dma.vmem_to_hbm [thread:$0]  (%p1430_p9), %s1538_s20, 128, %s1536_s11, %s739_s17   ;;  %v974_v7 = vpop.f32.mrf.mxu0 }
 0x43c PF: > { %s765_s27 = sand.u32 1, %s1270_s21   ;;  %p1614_p3 = scmp.ne.s32.totalorder %s1599_s30, 0 }
 0x43d   : > { %p1615_p7 = scmp.ge.s32.totalorder %s1290_s26, 2  ;;  %s766_s29 = scalar_lea.sflag [#allocation5], %s765_s27 }
 0x43f   : > { %p1004_p11 = pnand %p1615_p7, %p1614_p3 }
 0x441   : > { %p1005_p5 = pneg %p1004_p11 }
 0x443   : > { %1265 = dma.done.wait (%p1005_p5), %s766_s29, 128  }
 0x444   : > { %1267 = vsyncadd (%p1005_p5), %s766_s29, 4294967168  ;;  %s26_s26 = sadd.s32 1, %s1290_s26   ;;  %s1616_s10 = sld [smem:[#allocation17_spill]] }
 0x445   : > { %p23_p10 = scmp.ge.s32.totalorder %s26_s26, 4   ;;  %s1617_s23 = sld [smem:[#allocation19_spill]] }
 0x446   : > { %s1618_s28 = sld [smem:[#allocation18_spill]]  ;;  %s1619_s21 = smov %s1274_s22 }
 0x447   : > { %s1621_s24 = smov %s1286_s25 }
 0x448   :  { %25 = sbr.rel (!%p23_p10) target bundleno = 13 (0xd), region = 115 }
 0x44a   : > { %s1620_s22 = smov %s1616_s10 }
 0x44c   : > { %s1622_s25 = smov %s1618_s28 }
 0x44d   :  { %771 = vsyncpa [#allocation4], 1 }
 0x44e   :  { %773 = vsyncpa [#allocation4 + $0x1], 1 }
 0x44f   :  { %774 = vsyncpa [#allocation7], 1 }
 0x450   :  { %776 = vsyncpa [#allocation7 + $0x1], 1 }
 0x451   :  { %777 = vsyncpa [#allocation10], 1 }
 0x452   :  { %778 = vsyncpa [#allocation5], 1 }
 0x453   :  { %780 = vsyncpa [#allocation5 + $0x1], 1 }

</bundles_post_ra>
